<compile_context>
chip_gen: v5e
topology: v5e:2x2
jax: 0.10.0
libtpu: 0.0.40
codegen_flags: <defaults>
</compile_context>

<pallas_src>
import functools

import jax
import jax.numpy as jnp
from jax.experimental import pallas as pl
from jax.experimental.pallas import tpu as pltpu

_LANES = 128
_SUBLANES = 8


def _round_up(x, m):
    return ((x + m - 1) // m) * m


def _mse_single_block_kernel(y_ref, yp_ref, out_ref, *, total_elems, fold_rows):
    """Whole problem in one VMEM block: sum of squares + divide, one shot."""
    diff = y_ref[...].astype(jnp.float32) - yp_ref[...].astype(jnp.float32)
    sq = diff * diff
    if fold_rows:
        # Sublane-aligned fold (rows,128) -> (8,128): pure VPU vreg adds, so
        # only a single (8,128) tile goes through the XLU cross-lane reduce.
        sq = jnp.sum(sq.reshape(fold_rows // _SUBLANES, _SUBLANES, _LANES), axis=0)
    out_ref[...] = (jnp.sum(sq) / jnp.float32(total_elems)).reshape(1, 1)


def _mse_tiled_kernel(y_ref, yp_ref, out_ref, acc_ref, *,
                      valid_rows, block_rows, steps_per_core, need_mask):
    """Streaming reduction: each core accumulates its rows into an (8,128) acc."""
    s = pl.program_id(1)

    @pl.when(s == 0)
    def _():
        acc_ref[...] = jnp.zeros_like(acc_ref)

    diff = y_ref[...].astype(jnp.float32) - yp_ref[...].astype(jnp.float32)
    sq = diff * diff

    if need_mask:
        # Ragged tail rows (and clamped phantom blocks past the end of the
        # array) are masked in-kernel instead of padding the inputs in HBM.
        c = pl.program_id(0)
        base_row = (c * steps_per_core + s) * block_rows
        rid = base_row + jax.lax.broadcasted_iota(
            jnp.int32, (block_rows, _LANES), 0)
        sq = jnp.where(rid < valid_rows, sq, 0.0)

    # Fold (block_rows,128) -> (8,128) with vreg-aligned grouping: the trailing
    # (8,128) of the reshape matches the vreg tile, so axis-0 sum is pure VPU
    # adds (no cross-lane work per step).
    acc_ref[...] += jnp.sum(
        sq.reshape(block_rows // _SUBLANES, _SUBLANES, _LANES), axis=0)

    # Each core emits its raw (8,128) partial; the cheap final reduce + divide
    # happens in the wrapper (keeps the XLU out of the hot loop entirely).
    @pl.when(s == pl.num_programs(1) - 1)
    def _():
        out_ref[...] = acc_ref[...].reshape(1, _SUBLANES, _LANES)


def mse_loss(y, y_pre, *, block_rows=4096, single_block_max_rows=2048,
             num_core_split=2):
    """Computes mean((y - y_pre)**2), matching the PyTorch Loss module."""
    assert y.shape == y_pre.shape
    total = int(y.size)
    itemsize = jnp.dtype(y.dtype).itemsize
    lane_aligned = (total % _LANES) == 0

    # ---------------- small path: one grid-free invocation -------------------
    if total <= single_block_max_rows * _LANES:
        if lane_aligned:
            rows = total // _LANES
            y_in = y.reshape(rows, _LANES)          # free bitcast reshape
            yp_in = y_pre.reshape(rows, _LANES)
            fold_rows = rows if rows % _SUBLANES == 0 else 0
        else:
            y_in = y.reshape(-1)
            yp_in = y_pre.reshape(-1)
            fold_rows = 0
        full_shape = y_in.shape
        zero_idx = (0,) * len(full_shape)
        cost = pl.CostEstimate(flops=3 * total, transcendentals=0,
                               bytes_accessed=2 * total * itemsize + 4)
        kernel = functools.partial(_mse_single_block_kernel,
                                   total_elems=total, fold_rows=fold_rows)
        out = pl.pallas_call(
            kernel,
            out_shape=jax.ShapeDtypeStruct((1, 1), jnp.float32),
            in_specs=[pl.BlockSpec(full_shape, lambda: zero_idx),
                      pl.BlockSpec(full_shape, lambda: zero_idx)],
            out_specs=pl.BlockSpec((1, 1), lambda: (0, 0)),
            cost_estimate=cost,
        )(y_in, yp_in)
        return out[0, 0]

    # ---------------- large path: tiled streaming reduction ------------------
    y_flat = y.reshape(-1)
    yp_flat = y_pre.reshape(-1)
    if not lane_aligned:
        # TODO(synk): avoid this full HBM pad copy for totals that are not a
        # multiple of 128 (needs 1-D blocks or a manual-DMA tail kernel).
        pad = (-total) % _LANES
        y_flat = jnp.pad(y_flat, (0, pad))
        yp_flat = jnp.pad(yp_flat, (0, pad))
    rows = y_flat.size // _LANES
    y2d = y_flat.reshape(rows, _LANES)               # free bitcast reshape
    yp2d = yp_flat.reshape(rows, _LANES)

    block_rows = max(_SUBLANES, (int(block_rows) // _SUBLANES) * _SUBLANES)
    block_rows = min(block_rows, _round_up(rows, _SUBLANES))
    num_blocks = -(-rows // block_rows)

    num_core_split = max(1, int(num_core_split))
    steps_per_core = -(-num_blocks // num_core_split)
    need_mask = (rows % block_rows != 0) or (
        steps_per_core * num_core_split != num_blocks)

    def in_index_map(c, s):
        b = c * steps_per_core + s
        # Clamp phantom blocks (past the end of the array) to the last real
        # block so their DMA stays in bounds; their contribution is masked out.
        return (jnp.minimum(b, num_blocks - 1), 0)

    block_bytes = block_rows * _LANES * itemsize
    # 2 inputs x 2 pipeline buffers + headroom for accumulator / partials.
    vmem_limit = int(max(4 * block_bytes + (2 << 20), 16 << 20))

    cost = pl.CostEstimate(
        flops=3 * total, transcendentals=0,
        bytes_accessed=2 * rows * _LANES * itemsize
        + num_core_split * _SUBLANES * _LANES * 4)

    kernel = functools.partial(
        _mse_tiled_kernel, valid_rows=rows, block_rows=block_rows,
        steps_per_core=steps_per_core, need_mask=need_mask)

    partials = pl.pallas_call(
        kernel,
        out_shape=jax.ShapeDtypeStruct(
            (num_core_split, _SUBLANES, _LANES), jnp.float32),
        grid_spec=pltpu.PrefetchScalarGridSpec(
            num_scalar_prefetch=0,
            grid=(num_core_split, steps_per_core),
            in_specs=[pl.BlockSpec((block_rows, _LANES), in_index_map),
                      pl.BlockSpec((block_rows, _LANES), in_index_map)],
            out_specs=pl.BlockSpec((1, _SUBLANES, _LANES),
                                   lambda c, s: (c, 0, 0)),
            scratch_shapes=[pltpu.VMEM((_SUBLANES, _LANES), jnp.float32)],
        ),
        compiler_params=pltpu.CompilerParams(
            dimension_semantics=("parallel", "arbitrary"),
            vmem_limit_bytes=vmem_limit,
        ),
        cost_estimate=cost,
    )(y2d, yp2d)

    # Tiny cross-core combine (num_core_split x (8,128) f32) + single divide.
    return jnp.sum(partials) / jnp.float32(total)


if __name__ == "__main__":
    key = jax.random.PRNGKey(0)
    k1, k2 = jax.random.split(key)
    # NCHW inputs, like a small conv-net target/prediction pair.
    y = jax.random.normal(k1, (2, 4, 16, 16), dtype=jnp.float32)
    y_pre = jax.random.normal(k2, (2, 4, 16, 16), dtype=jnp.float32)

    # Small-shape (single-block, grid-free) path.
    loss = mse_loss(y, y_pre)
    jax.block_until_ready(loss)
    ref = jnp.mean(jnp.square(y - y_pre))
    assert jnp.allclose(loss, ref, rtol=1e-6, atol=1e-6), (loss, ref)

    # Tiled streaming path, even block split across the 2-way core axis
    # (no masking needed), forced via small thresholds.
    k3, k4 = jax.random.split(k2)
    y_big = jax.random.normal(k3, (8, 8, 32, 128), dtype=jnp.float32)
    yp_big = jax.random.normal(k4, (8, 8, 32, 128), dtype=jnp.float32)
    loss_big = mse_loss(y_big, yp_big, block_rows=256, single_block_max_rows=64)
    jax.block_until_ready(loss_big)
    ref_big = jnp.mean(jnp.square(y_big - yp_big))
    assert jnp.allclose(loss_big, ref_big, rtol=1e-5, atol=1e-5), (loss_big, ref_big)

    # Tiled path with a ragged last block AND a phantom (clamped, fully
    # masked) block: 500 rows / block_rows=72 -> 7 blocks -> 2 cores x 4 steps.
    k5, k6 = jax.random.split(k4)
    y_rag = jax.random.normal(k5, (4, 5, 25, 128), dtype=jnp.float32)
    yp_rag = jax.random.normal(k6, (4, 5, 25, 128), dtype=jnp.float32)
    loss_rag = mse_loss(y_rag, yp_rag, block_rows=72, single_block_max_rows=64)
    jax.block_until_ready(loss_rag)
    ref_rag = jnp.mean(jnp.square(y_rag - yp_rag))
    assert jnp.allclose(loss_rag, ref_rag, rtol=1e-5, atol=1e-5), (loss_rag, ref_rag)

    print("KERNEL_OK")
</pallas_src>

<mosaic_0001>
module attributes {stable_mosaic.version = 11 : i64} {
  func.func @_mse_single_block_kernel(%arg0: memref<16x128xf32, #tpu.memory_space<vmem>>, %arg1: memref<16x128xf32, #tpu.memory_space<vmem>>, %arg2: memref<1x1xf32, #tpu.memory_space<vmem>>) attributes {dimension_semantics = [], scalar_prefetch = 0 : i64, scratch_operands = 0 : i64, tpu.core_type = #tpu.core_type<tc>} {
    %c0 = arith.constant 0 : index
    %c0_0 = arith.constant 0 : index
    %0 = vector.load %arg0[%c0, %c0_0] : memref<16x128xf32, #tpu.memory_space<vmem>>, vector<16x128xf32>
    %c0_1 = arith.constant 0 : index
    %c0_2 = arith.constant 0 : index
    %1 = vector.load %arg1[%c0_1, %c0_2] : memref<16x128xf32, #tpu.memory_space<vmem>>, vector<16x128xf32>
    %2 = arith.subf %0, %1 : vector<16x128xf32>
    %3 = arith.mulf %2, %2 : vector<16x128xf32>
    %4 = vector.shape_cast %3 : vector<16x128xf32> to vector<2x8x128xf32>
    %cst = arith.constant dense<0.000000e+00> : vector<8x128xf32>
    %5 = vector.multi_reduction <add>, %4, %cst [0] : vector<2x8x128xf32> to vector<8x128xf32>
    %6 = vector.shape_cast %5 : vector<8x128xf32> to vector<1x8x128xf32>
    %cst_3 = arith.constant dense<0.000000e+00> : vector<1xf32>
    %7 = vector.multi_reduction <add>, %6, %cst_3 [1, 2] : vector<1x8x128xf32> to vector<1xf32>
    %8 = vector.shape_cast %7 : vector<1xf32> to vector<1x1x1xf32>
    %9 = vector.extract %8[0, 0, 0] : f32 from vector<1x1x1xf32>
    %cst_4 = arith.constant 2.048000e+03 : f32
    %10 = arith.divf %9, %cst_4 : f32
    %11 = vector.broadcast %10 : f32 to vector<1x1xf32>
    %c0_5 = arith.constant 0 : index
    %c0_6 = arith.constant 0 : index
    %12 = vector.load %arg2[%c0_5, %c0_6] : memref<1x1xf32, #tpu.memory_space<vmem>>, vector<1x1xf32>
    tpu.vector_store %arg2[%c0_5, %c0_6], %11 {strides = array<i32>} : memref<1x1xf32, #tpu.memory_space<vmem>>, vector<1x1xf32>,
    return
  }
}

</mosaic_0001>

<bundles_post_ra>
// kernel: tpu_custom_call.1
= control target key start
LH: loop header
LB: loop body
LE: loop exit
PB: predicated region body
PF: predicated region fallthrough
CT: control target
= control target key end

     0   :  { %7 = vsyncpa [#allocation3], 0  ;;  %s212_s0 = inlined_call_operand.hbm [shape: f32[16,128], index: 0, kind: input, shape index: {}]   ;;  %s213_s1 = inlined_call_operand.hbm [shape: f32[16,128], index: 1, kind: input, shape index: {}]   ;;  %s214_s2 = inlined_call_operand.hbm [shape: f32[1,1], index: 2, kind: output, shape index: {}]  }
   0x1   :  { %8 = vsyncpa [#allocation6], 0 }
   0x2   :  { %9 = vsyncpa [#allocation4], 0  ;;  %s14_s11 = sshll.u32 %s212_s0, 4  ;;  %s182_s12 = smov [#allocation2]   ;;  %s15_s11 = int_to_ptr.hbm [resolvable:$true] %s14_s11 }
   0x3   :  { %s16_s13 = sshll.u32 %s182_s12, 4  ;;  %s27_s16 = sshll.u32 %s213_s1, 4  ;;  %s17_s13 = int_to_ptr.vmem [resolvable:$true] %s16_s13  ;;  %s28_s16 = int_to_ptr.hbm [resolvable:$true] %s27_s16 }
   0x4   :  { %s183_s17 = smov 128   ;;  %s184_s18 = smov 8  }
   0x5   :  { %22 = dma.hbm_to_vmem [thread:$0]  %s15_s11, 256, %s17_s13, [#allocation3], %s183_s17, %s183_s17, %s184_s18  }
   0x6   :  { %s185_s19 = smov [#allocation5]  }
   0x7   :  { %s29_s20 = sshll.u32 %s185_s19, 4  ;;  %s30_s20 = int_to_ptr.vmem [resolvable:$true] %s29_s20 }
   0x8   :  { %35 = dma.hbm_to_vmem [thread:$0]  %s28_s16, 256, %s30_s20, [#allocation6], %s183_s17, %s183_s17, %s184_s18  }
   0x9   :  { %176 = dma.done.wait [#allocation3], 256  }
   0xa   :  { %177 = vsyncadd [#allocation3], 4294967040 }
   0xb   :  { %178 = dma.done.wait [#allocation6], 256  }
   0xc   :  { %179 = vsyncadd [#allocation6], 4294967040  ;;  %v44_v0 = vld [vmem:[#allocation2] sm:$0xff]  ;;  %v45_v1 = vld [vmem:[#allocation2 + $0x8] sm:$0xff]  ;;  %v186_v9 = vmov 2048.0   ;;  %s187_s0 = smov [#allocation7]  }
   0xd   :  { %v46_v2 = vld [vmem:[#allocation5] sm:$0xff]  ;;  %v47_v3 = vld [vmem:[#allocation5 + $0x8] sm:$0xff]  ;;  %102 = vrcp.f32 %v186_v9  ;;  %s79_s1 = sshll.u32 %s187_s0, 4  ;;  %s81_s24 = sshll.u32 %s214_s2, 4  ;;  %vm72_vm1 = vcmask 0   ;;  %s80_s1 = int_to_ptr.vmem [resolvable:$true] %s79_s1  ;;  %s82_s24 = int_to_ptr.hbm [resolvable:$true] %s81_s24 }
   0xe   :  { %v48_v4 = vsub.f32 %v44_v0, %v46_v2  ;;  %v49_v5 = vsub.f32 %v45_v1, %v47_v3 }
  0x10   :  { %v50_v6 = vmul.f32 %v48_v4, %v48_v4  ;;  %v51_v7 = vmul.f32 %v49_v5, %v49_v5 }
  0x12   :  { %v52_v8 = vadd.f32 %v51_v7, %v50_v6 }
  0x13   :  { %v103_v10 = vpop.eup %102 }
  0x14   :  { %53 = vadd.xlane.f32.xlu0 %v52_v8  ;;  %v63_v11 = vmul.f32 2048.0, %v103_v10  ;;  %vm67_vm0 = vweird.f32 %v103_v10 }
  0x16   :  { %v64_v12 = vsub.f32 1.0, %v63_v11 }
  0x18   :  { %v65_v16 = vmul.f32 %v103_v10, %v64_v12 }
  0x1a   :  { %v66_v19 = vadd.f32 %v103_v10, %v65_v16 }
  0x1c   :  { %v68_v22 = vsel %vm67_vm0, %v103_v10, %v66_v19 }
  0x87   :  { %v54_v13 = vpop.xlane.xlu0 %53 }
  0x88   :  { %v55_v14 = vrot.slane %v54_v13, 4 }
  0x8a   :  { %v56_v15 = vadd.f32 %v55_v14, %v54_v13 }
  0x8c   :  { %v57_v17 = vrot.slane %v56_v15, 2 }
  0x8e   :  { %v58_v18 = vadd.f32 %v57_v17, %v56_v15 }
  0x90   :  { %v59_v20 = vrot.slane %v58_v18, 1 }
  0x92   :  { %v60_v21 = vadd.f32 %v59_v20, %v58_v18 }
  0x94   :  { %92 = vpush %v60_v21 }
  0x95   :  { %94 = vpush %v68_v22 }
  0xc5   :  { %s93_s21 = spop %92 }
  0xc6   :  { %s95_s25 = spop %94 }
  0xc7   :  { %s70_s26 = smul.f32 %s95_s25, %s93_s21 }
  0xc9   :  { %v71_v23 = vstv %s70_s26 }
  0xca   :  { %73 = vst.msk [vmem:[#allocation7] sm:$0x1] %vm72_vm1, %v71_v23 }
  0xcb   :  { %84 = dma.vmem_to_hbm [thread:$0]  %s80_s1, 16, %s82_s24, [#allocation4]  }
  0xcc   :  { %180 = dma.done.wait [#allocation4], 16  }
  0xcd   :  { %181 = vsyncadd [#allocation4], 4294967280 }
  0xce   :  { %89 = vsyncpa [#allocation3], 1 }
  0xcf   :  { %90 = vsyncpa [#allocation6], 1 }
  0xd0   :  { %91 = vsyncpa [#allocation4], 1 }

</bundles_post_ra>
